<compile_context>
chip_gen: v6e
topology: v6e:2x2x1
jax: 0.10.0
libtpu: 0.0.40
codegen_flags: <defaults>
</compile_context>

<pallas_src>
import jax
import jax.numpy as jnp
from jax.experimental import pallas as pl
from jax.experimental.pallas import tpu as pltpu

EPS = 1e-5
LANES = 128


def _round_up(x, m):
    return ((x + m - 1) // m) * m


def _vmem_limit_bytes():
    """Generation-aware scoped-VMEM limit (v7x: 64 MiB physical -> 48; v5e/v6e: 64)."""
    cap = 64 * 1024 * 1024
    try:
        cap = int(getattr(pltpu.get_tpu_info(), "vmem_capacity_bytes", cap))
    except Exception:
        pass
    return 48 * 1024 * 1024 if cap <= 64 * 1024 * 1024 else 64 * 1024 * 1024


# ----------------------------- pass 1 kernels --------------------------------------
def _stats_kernel(patches_ref, w_ref, stats_ref):
    """Accumulate per-channel sum / sum-of-squares of the conv output (recompute flavour)."""

    @pl.when(pl.program_id(1) == 0)
    def _():
        stats_ref[...] = jnp.zeros_like(stats_ref)

    y = jnp.dot(patches_ref[...], w_ref[...], preferred_element_type=jnp.float32)
    stats_ref[0:1, :] += jnp.sum(y, axis=0, keepdims=True)
    stats_ref[1:2, :] += jnp.sum(y * y, axis=0, keepdims=True)


def _stats_stream_kernel(patches_ref, w_ref, stats_ref, y_ref):
    """Same as above, but also stream the bf16 conv result out for pass 2 (wide-K layers)."""

    @pl.when(pl.program_id(1) == 0)
    def _():
        stats_ref[...] = jnp.zeros_like(stats_ref)

    y = jnp.dot(patches_ref[...], w_ref[...], preferred_element_type=jnp.float32)
    stats_ref[0:1, :] += jnp.sum(y, axis=0, keepdims=True)
    stats_ref[1:2, :] += jnp.sum(y * y, axis=0, keepdims=True)
    y_ref[...] = y.astype(y_ref.dtype)


# ----------------------------- pass 2 kernels --------------------------------------
def _apply_recompute_kernel(patches_ref, w_ref, sc_ref, out_ref):
    """Recompute conv tile, then out = max(y*scale + shift, 0) (scale/shift pre-folded)."""
    y = jnp.dot(patches_ref[...], w_ref[...], preferred_element_type=jnp.float32)
    out_ref[...] = jnp.maximum(y * sc_ref[0:1, :] + sc_ref[1:2, :], 0.0).astype(out_ref.dtype)


def _apply_stream_kernel(y_ref, sc_ref, out_ref):
    """Read the streamed bf16 conv result, out = max(y*scale + shift, 0)."""
    y = y_ref[...].astype(jnp.float32)
    out_ref[...] = jnp.maximum(y * sc_ref[0:1, :] + sc_ref[1:2, :], 0.0).astype(out_ref.dtype)


# ----------------------------- wrapper ----------------------------------------------
def encoder_module_forward(x_nchw, weight, bias, gamma, beta, *, stride, pad,
                           tile_m_max=1024, out_dtype=jnp.bfloat16):
    """weight: (C_out, C_in, KH, KW) PyTorch OIHW; x_nchw: (N, C_in, H, W). Returns NCHW f32."""
    del bias  # Per-channel conv bias cancels exactly under train-mode BatchNorm.

    N, C_in, H, W = x_nchw.shape
    C_out, _, KH, KW = weight.shape
    H_out = (H + 2 * pad - KH) // stride + 1
    W_out = (W + 2 * pad - KW) // stride + 1
    M = N * H_out * W_out
    K = KH * KW * C_in

    C_pad = max(LANES, _round_up(C_out, LANES))
    K_pad = max(LANES, _round_up(K, LANES))

    # --- tile size from a generation-aware VMEM budget (double-buffered streams) ---
    vmem_limit = _vmem_limit_bytes()
    out_bytes = jnp.dtype(out_dtype).itemsize
    per_row = 2 * (K_pad * 2) + 2 * (C_pad * 2) + 2 * (C_pad * out_bytes)
    shared = 2 * (K_pad * C_pad * 2) + 4 * (8 * C_pad * 4)
    tm_cap = max(16, (vmem_limit // 2 - shared) // per_row)          # 50% budget: headroom
    tm = int(min(tile_m_max, tm_cap, _round_up(M, 16)))
    tm = max(16, (tm // 16) * 16)                                    # bf16 sublane packing

    n_tiles = pl.cdiv(M, tm)
    n_cores = 2 if n_tiles >= 2 else 1          # megacore-shard the pass-1 reduction on v7x
    tiles_total = _round_up(n_tiles, n_cores)
    tiles_per_core = tiles_total // n_cores
    M_pad = tiles_total * tm

    # Stream y through HBM instead of recomputing in pass 2 only when it is fewer HBM bytes
    # (y write + y read < second patches read), i.e. wide-K layers.
    stream_y = 2 * C_pad < K_pad

    # --- glue: im2col patches, bf16 from the start (NCHW -> NHWC -> (M, K)) -----------
    x = jnp.transpose(x_nchw, (0, 2, 3, 1)).astype(jnp.bfloat16)
    x = jnp.pad(x, ((0, 0), (pad, pad), (pad, pad), (0, 0)))
    cols = []
    for kh in range(KH):
        for kw in range(KW):
            cols.append(x[:, kh:kh + stride * H_out:stride, kw:kw + stride * W_out:stride, :])
    patches = jnp.concatenate(cols, axis=-1).reshape(M, K)
    # Zero-padded rows/lanes contribute 0 to sum/sumsq (stats divide by the true M) and land
    # in lanes whose gamma/beta are zero-padded, so they normalize to 0 and are sliced off.
    patches = jnp.pad(patches, ((0, M_pad - M), (0, K_pad - K)))

    w_mat = jnp.transpose(weight, (2, 3, 1, 0)).reshape(K, C_out).astype(jnp.bfloat16)
    w_mat = jnp.pad(w_mat, ((0, K_pad - K), (0, C_pad - C_out)))
    g = jnp.pad(gamma.astype(jnp.float32), (0, C_pad - C_out))
    bt = jnp.pad(beta.astype(jnp.float32), (0, C_pad - C_out))

    cparams_reduce = pltpu.CompilerParams(
        dimension_semantics=("parallel", "arbitrary"), vmem_limit_bytes=vmem_limit)
    cparams_parallel = pltpu.CompilerParams(
        dimension_semantics=("parallel",), vmem_limit_bytes=vmem_limit)

    # ---- Pass 1: per-core per-channel sum / sum-of-squares (optionally stream y) -----
    patches_spec1 = pl.BlockSpec((tm, K_pad), lambda c, i: (c * tiles_per_core + i, 0))
    w_spec1 = pl.BlockSpec((K_pad, C_pad), lambda c, i: (0, 0))
    stats_spec = pl.BlockSpec((8, C_pad), lambda c, i: (c, 0))
    stats_shape = jax.ShapeDtypeStruct((8 * n_cores, C_pad), jnp.float32)

    if stream_y:
        stats, y_bf16 = pl.pallas_call(
            _stats_stream_kernel,
            out_shape=(stats_shape, jax.ShapeDtypeStruct((M_pad, C_pad), jnp.bfloat16)),
            grid=(n_cores, tiles_per_core),
            in_specs=[patches_spec1, w_spec1],
            out_specs=(stats_spec,
                       pl.BlockSpec((tm, C_pad), lambda c, i: (c * tiles_per_core + i, 0))),
            compiler_params=cparams_reduce,
        )(patches, w_mat)
    else:
        stats = pl.pallas_call(
            _stats_kernel,
            out_shape=stats_shape,
            grid=(n_cores, tiles_per_core),
            in_specs=[patches_spec1, w_spec1],
            out_specs=stats_spec,
            compiler_params=cparams_reduce,
        )(patches, w_mat)
        y_bf16 = None

    # ---- Tiny XLA op between passes: fold BN into per-channel scale / shift ----------
    tot = jnp.sum(stats.reshape(n_cores, 8, C_pad), axis=0)
    mean = tot[0] * (1.0 / M)
    var = jnp.maximum(tot[1] * (1.0 / M) - mean * mean, 0.0)     # guard f32 cancellation
    inv_std = jax.lax.rsqrt(var + EPS)
    scale = g * inv_std                       # padded lanes: gamma==0 -> scale==0, shift==0
    shift = bt - mean * scale
    sc = jnp.zeros((8, C_pad), jnp.float32).at[0].set(scale).at[1].set(shift)

    # ---- Pass 2: y*scale + shift, ReLU, lane-dense (tm, 128) bf16 stores --------------
    out_shape2 = jax.ShapeDtypeStruct((M_pad, C_pad), out_dtype)
    out_spec2 = pl.BlockSpec((tm, C_pad), lambda i: (i, 0))
    sc_spec = pl.BlockSpec((8, C_pad), lambda i: (0, 0))

    if stream_y:
        out_flat = pl.pallas_call(
            _apply_stream_kernel,
            out_shape=out_shape2,
            grid=(tiles_total,),
            in_specs=[pl.BlockSpec((tm, C_pad), lambda i: (i, 0)), sc_spec],
            out_specs=out_spec2,
            compiler_params=cparams_parallel,
        )(y_bf16, sc)
    else:
        out_flat = pl.pallas_call(
            _apply_recompute_kernel,
            out_shape=out_shape2,
            grid=(tiles_total,),
            in_specs=[pl.BlockSpec((tm, K_pad), lambda i: (i, 0)),
                      pl.BlockSpec((K_pad, C_pad), lambda i: (0, 0)),
                      sc_spec],
            out_specs=out_spec2,
            compiler_params=cparams_parallel,
        )(patches, w_mat, sc)

    out = out_flat[:M, :C_out].astype(jnp.float32).reshape(N, H_out, W_out, C_out)
    return jnp.transpose(out, (0, 3, 1, 2))                      # back to NCHW


# ----------------------------- reference + tests ------------------------------------
def reference_forward(x, weight, bias, gamma, beta, *, stride, pad):
    y = jax.lax.conv_general_dilated(
        x.astype(jnp.float32), weight.astype(jnp.float32),
        window_strides=(stride, stride),
        padding=((pad, pad), (pad, pad)),
        dimension_numbers=("NCHW", "OIHW", "NCHW"))
    y = y + bias.reshape(1, -1, 1, 1)
    mean = jnp.mean(y, axis=(0, 2, 3), keepdims=True)
    var = jnp.mean((y - mean) ** 2, axis=(0, 2, 3), keepdims=True)
    yh = (y - mean) * jax.lax.rsqrt(var + EPS)
    out = gamma.reshape(1, -1, 1, 1) * yh + beta.reshape(1, -1, 1, 1)
    return jnp.maximum(out, 0.0)


def _run_case(key, N, C_in, H, W, C_out, kernel, stride, pad):
    kx, kw, kb, kg, kbe = jax.random.split(key, 5)
    x = jax.random.normal(kx, (N, C_in, H, W), dtype=jnp.float32)
    weight = 0.1 * jax.random.normal(kw, (C_out, C_in, kernel, kernel), dtype=jnp.float32)
    bias = 0.1 * jax.random.normal(kb, (C_out,), dtype=jnp.float32)
    gamma = 1.0 + 0.1 * jax.random.normal(kg, (C_out,), dtype=jnp.float32)
    beta = 0.1 * jax.random.normal(kbe, (C_out,), dtype=jnp.float32)

    out = encoder_module_forward(x, weight, bias, gamma, beta, stride=stride, pad=pad)
    out = jax.block_until_ready(out)
    ref = reference_forward(x, weight, bias, gamma, beta, stride=stride, pad=pad)

    H_out = (H + 2 * pad - kernel) // stride + 1
    W_out = (W + 2 * pad - kernel) // stride + 1
    assert out.shape == (N, C_out, H_out, W_out)
    # bf16 MXU operands + bf16 output stores -> slightly looser tolerance than pure f32.
    assert jnp.allclose(out, ref, atol=3e-2, rtol=3e-2), float(jnp.max(jnp.abs(out - ref)))


if __name__ == "__main__":
    key = jax.random.PRNGKey(0)
    k1, k2 = jax.random.split(key)
    # EncoderModule(4, 8, stride=1, kernel=3, pad=1) — recompute path (K_pad == C_pad).
    _run_case(k1, N=2, C_in=4, H=16, W=16, C_out=8, kernel=3, stride=1, pad=1)
    # Wider-K layer with stride 2 — exercises the stream-y path (2*C_pad < K_pad).
    _run_case(k2, N=2, C_in=32, H=8, W=8, C_out=8, kernel=3, stride=2, pad=1)
    print("KERNEL_OK")
</pallas_src>

<mosaic_0001>
module attributes {stable_mosaic.version = 11 : i64} {
  func.func @_stats_kernel(%arg0: i32, %arg1: i32, %arg2: memref<512x128xbf16, #tpu.memory_space<vmem>>, %arg3: memref<128x128xbf16, #tpu.memory_space<vmem>>, %arg4: memref<8x128xf32, #tpu.memory_space<vmem>>) attributes {dimension_semantics = [#tpu.dimension_semantics<parallel>, #tpu.dimension_semantics<arbitrary>], iteration_bounds = array<i64: 1, 1>, scalar_prefetch = 0 : i64, scratch_operands = 0 : i64, tpu.core_type = #tpu.core_type<tc>, window_params = [{transform_indices = @transform_0, window_bounds = array<i64: 512, 128>}, {pipeline_mode = #tpu.pipeline_mode<synchronous>, transform_indices = @transform_1, window_bounds = array<i64: 128, 128>}, {transform_indices = @transform_2, window_bounds = array<i64: 8, 128>}]} {
    %c0_i32 = arith.constant 0 : i32
    %0 = arith.cmpi eq, %arg1, %c0_i32 : i32
    %1 = arith.extui %0 : i1 to i32
    %c0_i32_0 = arith.constant 0 : i32
    %2 = arith.cmpi ne, %1, %c0_i32_0 : i32
    scf.if %2 {
      %cst_13 = arith.constant 0.000000e+00 : f32
      %17 = vector.broadcast %cst_13 : f32 to vector<8x128xf32>
      %c0_14 = arith.constant 0 : index
      %c0_15 = arith.constant 0 : index
      %18 = vector.load %arg4[%c0_14, %c0_15] : memref<8x128xf32, #tpu.memory_space<vmem>>, vector<8x128xf32>
      tpu.vector_store %arg4[%c0_14, %c0_15], %17 {strides = array<i32>} : memref<8x128xf32, #tpu.memory_space<vmem>>, vector<8x128xf32>,
    } else {
    }
    %c0 = arith.constant 0 : index
    %c0_1 = arith.constant 0 : index
    %3 = vector.load %arg2[%c0, %c0_1] : memref<512x128xbf16, #tpu.memory_space<vmem>>, vector<512x128xbf16>
    %c0_2 = arith.constant 0 : index
    %c0_3 = arith.constant 0 : index
    %4 = vector.load %arg3[%c0_2, %c0_3] : memref<128x128xbf16, #tpu.memory_space<vmem>>, vector<128x128xbf16>
    %cst = arith.constant dense<0.000000e+00> : vector<512x128xf32>
    %5 = tpu.matmul %3, %4, %cst {dimension_numbers = #tpu.dot_dimension_numbers<[1], [0], [0], [1], [0, 0, 1, 1], [], []>} : vector<512x128xbf16>, vector<128x128xbf16>, vector<512x128xf32> -> vector<512x128xf32>
    %c0_4 = arith.constant 0 : index
    %c0_5 = arith.constant 0 : index
    %6 = vector.load %arg4[%c0_4, %c0_5] : memref<8x128xf32, #tpu.memory_space<vmem>>, vector<1x128xf32>
    %cst_6 = arith.constant dense<0.000000e+00> : vector<128xf32>
    %7 = vector.multi_reduction <add>, %5, %cst_6 [0] : vector<512x128xf32> to vector<128xf32>
    %8 = vector.shape_cast %7 : vector<128xf32> to vector<1x128xf32>
    %9 = arith.addf %6, %8 : vector<1x128xf32>
    %c0_7 = arith.constant 0 : index
    %c0_8 = arith.constant 0 : index
    %10 = vector.load %arg4[%c0_7, %c0_8] : memref<8x128xf32, #tpu.memory_space<vmem>>, vector<1x128xf32>
    tpu.vector_store %arg4[%c0_7, %c0_8], %9 {strides = array<i32>} : memref<8x128xf32, #tpu.memory_space<vmem>>, vector<1x128xf32>,
    %c1 = arith.constant 1 : index
    %c0_9 = arith.constant 0 : index
    %11 = vector.load %arg4[%c1, %c0_9] : memref<8x128xf32, #tpu.memory_space<vmem>>, vector<1x128xf32>
    %12 = arith.mulf %5, %5 : vector<512x128xf32>
    %cst_10 = arith.constant dense<0.000000e+00> : vector<128xf32>
    %13 = vector.multi_reduction <add>, %12, %cst_10 [0] : vector<512x128xf32> to vector<128xf32>
    %14 = vector.shape_cast %13 : vector<128xf32> to vector<1x128xf32>
    %15 = arith.addf %11, %14 : vector<1x128xf32>
    %c1_11 = arith.constant 1 : index
    %c0_12 = arith.constant 0 : index
    %16 = vector.load %arg4[%c1_11, %c0_12] : memref<8x128xf32, #tpu.memory_space<vmem>>, vector<1x128xf32>
    tpu.vector_store %arg4[%c1_11, %c0_12], %15 {strides = array<i32>} : memref<8x128xf32, #tpu.memory_space<vmem>>, vector<1x128xf32>,
    return
  }
  func.func @transform_0(%arg0: i32, %arg1: i32) -> (i32, i32) {
    %c1_i32 = arith.constant 1 : i32
    %0 = arith.muli %arg0, %c1_i32 : i32
    %1 = arith.addi %0, %arg1 : i32
    %c0_i32 = arith.constant 0 : i32
    %c0_i32_0 = arith.constant 0 : i32
    return %1, %c0_i32 : i32, i32
  }
  func.func @transform_1(%arg0: i32, %arg1: i32) -> (i32, i32) {
    %c0_i32 = arith.constant 0 : i32
    %c0_i32_0 = arith.constant 0 : i32
    %c0_i32_1 = arith.constant 0 : i32
    return %c0_i32, %c0_i32_0 : i32, i32
  }
  func.func @transform_2(%arg0: i32, %arg1: i32) -> (i32, i32) {
    %c0_i32 = arith.constant 0 : i32
    %c0_i32_0 = arith.constant 0 : i32
    return %arg0, %c0_i32 : i32, i32
  }
}

</mosaic_0001>

<bundles_post_ra>
// kernel: tpu_custom_call.1
= control target key start
LH: loop header
LB: loop body
LE: loop exit
PB: predicated region body
PF: predicated region fallthrough
CT: control target
= control target key end

     0   :  { %7 = vsyncpa [#allocation3], 0  ;;  %s1283_s0 = inlined_call_operand.hbm [shape: bf16[512,128], index: 0, kind: input, shape index: {}]   ;;  %s1284_s1 = inlined_call_operand.hbm [shape: bf16[128,128], index: 1, kind: input, shape index: {}]   ;;  %s1285_s2 = inlined_call_operand.hbm [shape: f32[8,128], index: 2, kind: output, shape index: {}]  }
   0x1   :  { %8 = vsyncpa [#allocation6], 0 }
   0x2   :  { %9 = vsyncpa [#allocation4], 0  ;;  %s1173_s9 = smov [#allocation2]  }
   0x3   :  { %s19_s10 = sshll.u32 %s1173_s9, 4  ;;  %s20_s10 = int_to_ptr.vmem [resolvable:$true] %s19_s10 }
   0x4   :  { %s1115_s11 = scalar_lea.vmem %s20_s10, 4096  ;;  %p1120_p1 = scmp.lt.s32.totalorder %s20_s10, %s20_s10 }
   0x5   :  { %p1116_p0 = scmp.ne.s32.totalorder %s20_s10, %s1115_s11  ;;  %p1121_p2 = scmp.lt.s32.totalorder %s1115_s11, %s1115_s11 }
   0x7   :  { %p1122_p3 = por %p1121_p2, %p1120_p1 }
   0x9   :  { %p1123_p4 = pnand %p1122_p3, %p1116_p0 }
   0xb   :  { %1126 = shalt.err (!%p1123_p4)
}
   0xc   :  { %s1174_s12 = smov 64   ;;  %s1175_s13 = smov 4  }
   0xd   :  { %25 = dma.hbm_to_vmem [thread:$0]  %s1283_s0, 4096, %s20_s10, [#allocation3], %s1174_s12, %s1174_s12, %s1175_s13  }
   0xe   :  { %s1176_s16 = smov [#allocation5]  }
   0xf   :  { %s31_s17 = sshll.u32 %s1176_s16, 4  ;;  %s32_s17 = int_to_ptr.vmem [resolvable:$true] %s31_s17 }
  0x10   :  { %s1135_s18 = scalar_lea.vmem %s32_s17, 1024  ;;  %p1140_p6 = scmp.lt.s32.totalorder %s32_s17, %s32_s17 }
  0x11   :  { %p1136_p5 = scmp.ne.s32.totalorder %s32_s17, %s1135_s18  ;;  %p1141_p7 = scmp.lt.s32.totalorder %s1135_s18, %s1135_s18 }
  0x13   :  { %p1142_p8 = por %p1141_p7, %p1140_p6 }
  0x15   :  { %p1143_p9 = pnand %p1142_p8, %p1136_p5 }
  0x17   :  { %1146 = shalt.err (!%p1143_p9)
}
  0x18   :  { %37 = dma.hbm_to_vmem [thread:$0]  %s1284_s1, 1024, %s32_s17, [#allocation6], %s1174_s12, %s1174_s12, %s1175_s13  }
  0x19   :  { %1167 = dma.done.wait [#allocation3], 4096  }
  0x1a   :  { %1168 = vsyncadd [#allocation3], 4294963200 }
  0x1b   :  { %1169 = dma.done.wait [#allocation6], 1024  }
  0x1c   :  { %1170 = vsyncadd [#allocation6], 4294966272  ;;  %v1067_v0 = vld [vmem:[#allocation5 + $0x38] sm:$0xff]   ;;  %v1068_v1 = vld [vmem:[#allocation5 + $0x30] sm:$0xff]   ;;  %v1177_v54 = vmov 0.0   ;;  %s1178_s0 = smov [#allocation7]  }
  0x1d   :  { %965 = vmatprep.subr.bf16.mxu0 %v1067_v0  ;;  %1045 = vmatprep.subr.bf16.mxu1 %v1067_v0  ;;  %v1069_v2 = vld [vmem:[#allocation5 + $0x28] sm:$0xff]   ;;  %v1070_v3 = vld [vmem:[#allocation5 + $0x20] sm:$0xff]   ;;  %v1071_v5 = vld [vmem:[#allocation5 + $0x18] sm:$0xff]   ;;  %51 = vst [vmem:[#allocation7] sm:$0xff] %v1177_v54  ;;  %s875_s1 = sshll.u32 %s1178_s0, 4  ;;  %s876_s1 = int_to_ptr.vmem [resolvable:$true] %s875_s1 }
  0x1e   :  { %966 = vmatpush3.bf16.msra.mxu0 %v1067_v0  ;;  %1053 = vmatpush3.bf16.msra.mxu1 %v1067_v0  ;;  %v1075_v4 = vld [vmem:[#allocation2] sm:$0xff]   ;;  %v1072_v6 = vld [vmem:[#allocation5 + $0x10] sm:$0xff]   ;;  %v1073_v7 = vld [vmem:[#allocation5 + $0x8] sm:$0xff]   ;;  %s1147_s21 = scalar_lea.vmem %s876_s1, 128  ;;  %p1152_p11 = scmp.lt.s32.totalorder %s876_s1, %s876_s1 }
  0x1f   :  { %967 = vmatprep.subr.bf16.mxu0 %v1068_v1  ;;  %1046 = vmatprep.subr.bf16.mxu1 %v1068_v1  ;;  %v1074_v8 = vld [vmem:[#allocation5] sm:$0xff]   ;;  %v1076_v10 = vld [vmem:[#allocation2 + $0x8] sm:$0xff]   ;;  %v1077_v11 = vld [vmem:[#allocation2 + $0x10] sm:$0xff]   ;;  %p1148_p10 = scmp.ne.s32.totalorder %s876_s1, %s1147_s21  ;;  %p1153_p12 = scmp.lt.s32.totalorder %s1147_s21, %s1147_s21 }
  0x20   :  { %981 = vmatprep.mubr.bf16.mxu0 %v1075_v4  ;;  %v1091_v9 = vld [vmem:[#allocation2 + $0x80] sm:$0xff]   ;;  %v1092_v12 = vld [vmem:[#allocation2 + $0x88] sm:$0xff]   ;;  %v1093_v13 = vld [vmem:[#allocation2 + $0x90] sm:$0xff]  }
  0x21   :  { %1013 = vmatprep.mubr.bf16.mxu1 %v1091_v9  ;;  %v1078_v14 = vld [vmem:[#allocation2 + $0x18] sm:$0xff]   ;;  %v1079_v15 = vld [vmem:[#allocation2 + $0x20] sm:$0xff]   ;;  %v1080_v18 = vld [vmem:[#allocation2 + $0x28] sm:$0xff]   ;;  %p1154_p13 = por %p1153_p12, %p1152_p11 }
  0x22   :  { %968 = vmatpush3.bf16.msra.mxu0 %v1068_v1  ;;  %1054 = vmatpush3.bf16.msra.mxu1 %v1068_v1  ;;  %v1094_v16 = vld [vmem:[#allocation2 + $0x98] sm:$0xff]   ;;  %v1095_v17 = vld [vmem:[#allocation2 + $0xa0] sm:$0xff]   ;;  %v1096_v19 = vld [vmem:[#allocation2 + $0xa8] sm:$0xff]  }
  0x23   :  { %969 = vmatprep.subr.bf16.mxu0 %v1069_v2  ;;  %1047 = vmatprep.subr.bf16.mxu1 %v1069_v2  ;;  %v1081_v20 = vld [vmem:[#allocation2 + $0x30] sm:$0xff]   ;;  %v1082_v22 = vld [vmem:[#allocation2 + $0x38] sm:$0xff]   ;;  %v1083_v24 = vld [vmem:[#allocation2 + $0x40] sm:$0xff]   ;;  %p1155_p0 = pnand %p1154_p13, %p1148_p10 }
  0x24   :  { %v1097_v21 = vld [vmem:[#allocation2 + $0xb0] sm:$0xff]   ;;  %v1098_v23 = vld [vmem:[#allocation2 + $0xb8] sm:$0xff]   ;;  %v1099_v25 = vld [vmem:[#allocation2 + $0xc0] sm:$0xff]  }
  0x25   :  { %v1084_v26 = vld [vmem:[#allocation2 + $0x48] sm:$0xff]   ;;  %v1085_v28 = vld [vmem:[#allocation2 + $0x50] sm:$0xff]   ;;  %v1086_v30 = vld [vmem:[#allocation2 + $0x58] sm:$0xff]  }
  0x26   :  { %970 = vmatpush3.bf16.msra.mxu0 %v1069_v2  ;;  %1055 = vmatpush3.bf16.msra.mxu1 %v1069_v2  ;;  %v1100_v27 = vld [vmem:[#allocation2 + $0xc8] sm:$0xff]   ;;  %v1101_v29 = vld [vmem:[#allocation2 + $0xd0] sm:$0xff]   ;;  %v1102_v31 = vld [vmem:[#allocation2 + $0xd8] sm:$0xff]  }
  0x27   :  { %971 = vmatprep.subr.bf16.mxu0 %v1070_v3  ;;  %1048 = vmatprep.subr.bf16.mxu1 %v1070_v3  ;;  %v1087_v32 = vld [vmem:[#allocation2 + $0x60] sm:$0xff]   ;;  %v1088_v34 = vld [vmem:[#allocation2 + $0x68] sm:$0xff]   ;;  %v1089_v36 = vld [vmem:[#allocation2 + $0x70] sm:$0xff]  }
  0x28   :  { %v1103_v33 = vld [vmem:[#allocation2 + $0xe0] sm:$0xff]   ;;  %v1104_v35 = vld [vmem:[#allocation2 + $0xe8] sm:$0xff]   ;;  %v1105_v37 = vld [vmem:[#allocation2 + $0xf0] sm:$0xff]  }
  0x29   :  { %v1090_v38 = vld [vmem:[#allocation2 + $0x78] sm:$0xff]  }
  0x2a   :  { %972 = vmatpush3.bf16.msra.mxu0 %v1070_v3  ;;  %1056 = vmatpush3.bf16.msra.mxu1 %v1070_v3  ;;  %v1106_v39 = vld [vmem:[#allocation2 + $0xf8] sm:$0xff]  }
  0x2b   :  { %973 = vmatprep.subr.bf16.mxu0 %v1071_v5  ;;  %1049 = vmatprep.subr.bf16.mxu1 %v1071_v5 }
  0x2e   :  { %974 = vmatpush3.bf16.msra.mxu0 %v1071_v5  ;;  %1057 = vmatpush3.bf16.msra.mxu1 %v1071_v5 }
  0x2f   :  { %975 = vmatprep.subr.bf16.mxu0 %v1072_v6  ;;  %1050 = vmatprep.subr.bf16.mxu1 %v1072_v6 }
  0x32   :  { %976 = vmatpush3.bf16.msra.mxu0 %v1072_v6  ;;  %1058 = vmatpush3.bf16.msra.mxu1 %v1072_v6 }
  0x33   :  { %977 = vmatprep.subr.bf16.mxu0 %v1073_v7  ;;  %1051 = vmatprep.subr.bf16.mxu1 %v1073_v7 }
  0x36   :  { %978 = vmatpush3.bf16.msra.mxu0 %v1073_v7  ;;  %1059 = vmatpush3.bf16.msra.mxu1 %v1073_v7 }
  0x37   :  { %979 = vmatprep.subr.bf16.mxu0 %v1074_v8  ;;  %1052 = vmatprep.subr.bf16.mxu1 %v1074_v8 }
  0x3a   :  { %980 = vmatpush3.bf16.msra.mxu0 %v1074_v8  ;;  %1060 = vmatpush3.bf16.msra.mxu1 %v1074_v8 }
  0x3d   :  { %982 = vmatmul.mubr.bf16.vlgmr.msra.gmra.mxu0 %v1076_v10  ;;  %1014 = vmatmul.mubr.bf16.vlgmr.msra.gmra.mxu1 %v1092_v12 }
  0x3e   :  { %985 = vmatprep.mubr.bf16.mxu0 %v1077_v11  ;;  %1017 = vmatprep.mubr.bf16.mxu1 %v1093_v13 }
  0x45   :  { %986 = vmatmul.mubr.bf16.gmra.mxu0 %v1078_v14  ;;  %1018 = vmatmul.mubr.bf16.gmra.mxu1 %v1094_v16 }
  0x46   :  { %989 = vmatprep.mubr.bf16.mxu0 %v1079_v15  ;;  %1021 = vmatprep.mubr.bf16.mxu1 %v1095_v17 }
  0x4d   :  { %990 = vmatmul.mubr.bf16.gmra.mxu0 %v1080_v18  ;;  %1022 = vmatmul.mubr.bf16.gmra.mxu1 %v1096_v19 }
  0x4e   :  { %993 = vmatprep.mubr.bf16.mxu0 %v1081_v20  ;;  %1025 = vmatprep.mubr.bf16.mxu1 %v1097_v21 }
  0x55   :  { %994 = vmatmul.mubr.bf16.gmra.mxu0 %v1082_v22  ;;  %1026 = vmatmul.mubr.bf16.gmra.mxu1 %v1098_v23 }
  0x56   :  { %997 = vmatprep.mubr.bf16.mxu0 %v1083_v24  ;;  %1029 = vmatprep.mubr.bf16.mxu1 %v1099_v25 }
  0x5d   :  { %998 = vmatmul.mubr.bf16.gmra.mxu0 %v1084_v26  ;;  %1030 = vmatmul.mubr.bf16.gmra.mxu1 %v1100_v27 }
  0x5e   :  { %1001 = vmatprep.mubr.bf16.mxu0 %v1085_v28  ;;  %1033 = vmatprep.mubr.bf16.mxu1 %v1101_v29 }
  0x65   :  { %1002 = vmatmul.mubr.bf16.gmra.mxu0 %v1086_v30  ;;  %1034 = vmatmul.mubr.bf16.gmra.mxu1 %v1102_v31 }
  0x66   :  { %1005 = vmatprep.mubr.bf16.mxu0 %v1087_v32  ;;  %1037 = vmatprep.mubr.bf16.mxu1 %v1103_v33 }
  0x6d   :  { %1006 = vmatmul.mubr.bf16.gmra.mxu0 %v1088_v34  ;;  %1038 = vmatmul.mubr.bf16.gmra.mxu1 %v1104_v35 }
  0x6e   :  { %1009 = vmatprep.mubr.bf16.mxu0 %v1089_v36  ;;  %1041 = vmatprep.mubr.bf16.mxu1 %v1105_v37 }
  0x75   :  { %1010 = vmatmul.mubr.bf16.gmra.mxu0 %v1090_v38  ;;  %1042 = vmatmul.mubr.bf16.gmra.mxu1 %v1106_v39 }
  0xfd   :  { %v983_v40 = vpop.f32.mrf.mxu0  ;;  %v1200_v41 = vpop.f32.mrf.mxu1 }
  0xfe   :  { %v736_v51 = vmul.f32 %v983_v40, %v983_v40 }
  0xff   :  { %v406_v42 = vpop.f32.mrf.mxu0  ;;  %v1202_v44 = vpop.f32.mrf.mxu1 }
 0x100   :  { %v734_v46 = vmul.f32 %v406_v42, %v406_v42 }
 0x101   :  { %v984_v43 = vpop.f32.mrf.mxu0  ;;  %v1204_v50 = vpop.f32.mrf.mxu1 }
 0x102   :  { %v737_v56 = vmul.f32 %v984_v43, %v984_v43 }
 0x103   :  { %v409_v45 = vpop.f32.mrf.mxu0  ;;  %v1206_v60 = vpop.f32.mrf.mxu1 }
 0x104   :  { %v662_v47 = vadd.f32 %v409_v45, %v406_v42  ;;  %v735_v48 = vmul.f32 %v409_v45, %v409_v45 }
 0x105   :  { %v987_v49 = vpop.f32.mrf.mxu0  ;;  %v1208_v5 = vpop.f32.mrf.mxu1 }
 0x106   :  { %v663_v52 = vadd.f32 %v983_v40, %v662_v47  ;;  %v798_v53 = vadd.f32 %v735_v48, %v734_v46  ;;  %v740_v6 = vmul.f32 %v987_v49, %v987_v49 }
 0x107   :  { %v422_v55 = vpop.f32.mrf.mxu0  ;;  %v1210_v14 = vpop.f32.mrf.mxu1 }
 0x108   :  { %v799_v57 = vadd.f32 %v798_v53, %v736_v51  ;;  %v664_v58 = vadd.f32 %v984_v43, %v663_v52  ;;  %v738_v62 = vmul.f32 %v422_v55, %v422_v55 }
 0x109   :  { %v988_v59 = vpop.f32.mrf.mxu0  ;;  %v1212_v23 = vpop.f32.mrf.mxu1 }
 0x10a   :  { %v665_v61 = vadd.f32 %v664_v58, %v422_v55  ;;  %v800_v63 = vadd.f32 %v799_v57, %v737_v56  ;;  %v741_v10 = vmul.f32 %v988_v59, %v988_v59 }
 0x10b   :  { %v425_v0 = vpop.f32.mrf.mxu0  ;;  %v1214_v32 = vpop.f32.mrf.mxu1 }
 0x10c   :  { %v801_v1 = vadd.f32 %v800_v63, %v738_v62  ;;  %v666_v2 = vadd.f32 %v665_v61, %v425_v0  ;;  %v739_v3 = vmul.f32 %v425_v0, %v425_v0 }
 0x10d   :  { %v991_v4 = vpop.f32.mrf.mxu0  ;;  %v1216_v42 = vpop.f32.mrf.mxu1 }
 0x10e   :  { %v667_v7 = vadd.f32 %v987_v49, %v666_v2  ;;  %v802_v8 = vadd.f32 %v801_v1, %v739_v3  ;;  %v744_v24 = vmul.f32 %v991_v4, %v991_v4 }
 0x10f   :  { %v438_v9 = vpop.f32.mrf.mxu0  ;;  %v1218_v53 = vpop.f32.mrf.mxu1 }
 0x110   :  { %v803_v11 = vadd.f32 %v802_v8, %v740_v6  ;;  %v668_v12 = vadd.f32 %v988_v59, %v667_v7  ;;  %v742_v16 = vmul.f32 %v438_v9, %v438_v9 }
 0x111   :  { %v992_v13 = vpop.f32.mrf.mxu0  ;;  %v1220_v63 = vpop.f32.mrf.mxu1 }
 0x112   :  { %v669_v15 = vadd.f32 %v668_v12, %v438_v9  ;;  %v804_v17 = vadd.f32 %v803_v11, %v741_v10  ;;  %v745_v28 = vmul.f32 %v992_v13, %v992_v13 }
 0x113   :  { %v441_v18 = vpop.f32.mrf.mxu0  ;;  %v1222_v9 = vpop.f32.mrf.mxu1 }
 0x114   :  { %v805_v19 = vadd.f32 %v804_v17, %v742_v16  ;;  %v670_v20 = vadd.f32 %v669_v15, %v441_v18  ;;  %v743_v21 = vmul.f32 %v441_v18, %v441_v18 }
 0x115   :  { %v995_v22 = vpop.f32.mrf.mxu0 }
 0x116   :  { %v671_v25 = vadd.f32 %v991_v4, %v670_v20  ;;  %v806_v26 = vadd.f32 %v805_v19, %v743_v21  ;;  %v748_v43 = vmul.f32 %v995_v22, %v995_v22  ;;  %v1224_v19 = vpop.f32.mrf.mxu1 }
 0x117   :  { %v454_v27 = vpop.f32.mrf.mxu0 }
 0x118   :  { %v807_v29 = vadd.f32 %v806_v26, %v744_v24  ;;  %v672_v30 = vadd.f32 %v992_v13, %v671_v25  ;;  %v746_v34 = vmul.f32 %v454_v27, %v454_v27 }
 0x119   :  { %v996_v31 = vpop.f32.mrf.mxu0 }
 0x11a   :  { %v673_v33 = vadd.f32 %v672_v30, %v454_v27  ;;  %v808_v35 = vadd.f32 %v807_v29, %v745_v28  ;;  %v749_v48 = vmul.f32 %v996_v31, %v996_v31  ;;  %v1226_v29 = vpop.f32.mrf.mxu1 }
 0x11b   :  { %v457_v36 = vpop.f32.mrf.mxu0 }
 0x11c   :  { %v809_v37 = vadd.f32 %v808_v35, %v746_v34  ;;  %v674_v38 = vadd.f32 %v673_v33, %v457_v36  ;;  %v747_v39 = vmul.f32 %v457_v36, %v457_v36 }
 0x11d   :  { %v999_v40 = vpop.f32.mrf.mxu0 }
 0x11e   :  { %v675_v45 = vadd.f32 %v995_v22, %v674_v38  ;;  %v810_v46 = vadd.f32 %v809_v37, %v747_v39  ;;  %v752_v0 = vmul.f32 %v999_v40, %v999_v40  ;;  %v1228_v39 = vpop.f32.mrf.mxu1 }
 0x11f   :  { %v470_v47 = vpop.f32.mrf.mxu0 }
 0x120   :  { %v811_v49 = vadd.f32 %v810_v46, %v748_v43  ;;  %v676_v51 = vadd.f32 %v996_v31, %v675_v45  ;;  %v750_v55 = vmul.f32 %v470_v47, %v470_v47 }
 0x121   :  { %v1000_v52 = vpop.f32.mrf.mxu0 }
 0x122   :  { %v677_v54 = vadd.f32 %v676_v51, %v470_v47  ;;  %v812_v56 = vadd.f32 %v811_v49, %v749_v48  ;;  %v753_v4 = vmul.f32 %v1000_v52, %v1000_v52 }
 0x123   :  { %v473_v57 = vpop.f32.mrf.mxu0 }
 0x124   :  { %v813_v58 = vadd.f32 %v812_v56, %v750_v55  ;;  %v678_v59 = vadd.f32 %v677_v54, %v473_v57  ;;  %v751_v61 = vmul.f32 %v473_v57, %v473_v57 }
 0x125   :  { %v1003_v62 = vpop.f32.mrf.mxu0 }
 0x126   :  { %v679_v1 = vadd.f32 %v999_v40, %v678_v59  ;;  %v814_v2 = vadd.f32 %v813_v58, %v751_v61  ;;  %v756_v20 = vmul.f32 %v1003_v62, %v1003_v62 }
 0x127   :  { %v486_v3 = vpop.f32.mrf.mxu0 }
 0x128   :  { %v815_v6 = vadd.f32 %v814_v2, %v752_v0  ;;  %v680_v7 = vadd.f32 %v1000_v52, %v679_v1  ;;  %v754_v11 = vmul.f32 %v486_v3, %v486_v3  ;;  %v585_v52 = vpop.f32.mrf.mxu1 }
 0x129   :  { %v1004_v8 = vpop.f32.mrf.mxu0 }
 0x12a   :  { %v681_v10 = vadd.f32 %v680_v7, %v486_v3  ;;  %v816_v12 = vadd.f32 %v815_v6, %v753_v4  ;;  %v757_v25 = vmul.f32 %v1004_v8, %v1004_v8 }
 0x12b   :  { %v489_v13 = vpop.f32.mrf.mxu0 }
 0x12c   :  { %v817_v15 = vadd.f32 %v816_v12, %v754_v11  ;;  %v682_v16 = vadd.f32 %v681_v10, %v489_v13  ;;  %v755_v17 = vmul.f32 %v489_v13, %v489_v13  ;;  %v767_v13 = vmul.f32 %v1206_v60, %v1206_v60 }
 0x12d   :  { %v1007_v18 = vpop.f32.mrf.mxu0 }
 0x12e   :  { %v683_v21 = vadd.f32 %v1003_v62, %v682_v16  ;;  %v818_v22 = vadd.f32 %v817_v15, %v755_v17  ;;  %v760_v40 = vmul.f32 %v1007_v18, %v1007_v18  ;;  %v1230_v62 = vpop.f32.mrf.mxu1  ;;  %v768_v17 = vmul.f32 %v1200_v41, %v1200_v41 }
 0x12f   :  { %v502_v24 = vpop.f32.mrf.mxu0 }
 0x130   :  { %v819_v26 = vadd.f32 %v818_v22, %v756_v20  ;;  %v684_v27 = vadd.f32 %v1004_v8, %v683_v21  ;;  %v758_v31 = vmul.f32 %v502_v24, %v502_v24  ;;  %v598_v7 = vpop.f32.mrf.mxu1  ;;  %v766_v8 = vmul.f32 %v1202_v44, %v1202_v44 }
 0x131   :  { %v1008_v28 = vpop.f32.mrf.mxu0  ;;  %v769_v21 = vmul.f32 %v1204_v50, %v1204_v50 }
 0x132   :  { %v685_v30 = vadd.f32 %v684_v27, %v502_v24  ;;  %v820_v33 = vadd.f32 %v819_v26, %v757_v25  ;;  %v761_v47 = vmul.f32 %v1008_v28, %v1008_v28  ;;  %v1032_v16 = vpop.f32.mrf.mxu1 }
 0x133   :  { %v505_v34 = vpop.f32.mrf.mxu0 }
 0x134   :  { %v821_v35 = vadd.f32 %v820_v33, %v758_v31  ;;  %v686_v36 = vadd.f32 %v685_v30, %v505_v34  ;;  %v759_v37 = vmul.f32 %v505_v34, %v505_v34  ;;  %v772_v31 = vmul.f32 %v1208_v5, %v1208_v5 }
 0x135   :  { %v1011_v38 = vpop.f32.mrf.mxu0  ;;  %v773_v34 = vmul.f32 %v1212_v23, %v1212_v23 }
 0x136   :  { %v687_v43 = vadd.f32 %v1007_v18, %v686_v36  ;;  %v822_v45 = vadd.f32 %v821_v35, %v759_v37  ;;  %v764_v0 = vmul.f32 %v1011_v38, %v1011_v38 }
 0x137   :  { %v518_v46 = vpop.f32.mrf.mxu0 }
 0x138   :  { %v823_v48 = vadd.f32 %v822_v45, %v760_v40  ;;  %v688_v49 = vadd.f32 %v1008_v28, %v687_v43  ;;  %v762_v55 = vmul.f32 %v518_v46, %v518_v46 }
 0x139   :  { %v1012_v51 = vpop.f32.mrf.mxu0 }
 0x13a   :  { %v689_v54 = vadd.f32 %v688_v49, %v518_v46  ;;  %v824_v56 = vadd.f32 %v823_v48, %v761_v47  ;;  %v765_v3 = vmul.f32 %v1012_v51, %v1012_v51  ;;  %v776_v46 = vmul.f32 %v1216_v42, %v1216_v42 }
 0x13b   :  { %v521_v57 = vpop.f32.mrf.mxu0  ;;  %v777_v48 = vmul.f32 %v1220_v63, %v1220_v63 }
 0x13c   :  { %v825_v58 = vadd.f32 %v824_v56, %v762_v55  ;;  %v690_v59 = vadd.f32 %v689_v54, %v521_v57  ;;  %v763_v61 = vmul.f32 %v521_v57, %v521_v57  ;;  %v778_v55 = vmul.f32 %v1226_v29, %v1226_v29 }
 0x13e   :  { %v691_v1 = vadd.f32 %v1011_v38, %v690_v59  ;;  %v826_v2 = vadd.f32 %v825_v58, %v763_v61  ;;  %v774_v38 = vmul.f32 %v1218_v53, %v1218_v53  ;;  %v779_v58 = vmul.f32 %v585_v52, %v585_v52 }
 0x140   :  { %v692_v4 = vadd.f32 %v1012_v51, %v691_v1  ;;  %v827_v6 = vadd.f32 %v826_v2, %v764_v0 }
 0x142   :  { %v828_v10 = vadd.f32 %v827_v6, %v765_v3  ;;  %v693_v11 = vadd.f32 %v692_v4, %v1202_v44  ;;  %v601_v44 = vpop.f32.mrf.mxu1 }
 0x144   :  { %v694_v12 = vadd.f32 %v693_v11, %v1206_v60  ;;  %v829_v15 = vadd.f32 %v828_v10, %v766_v8  ;;  %v770_v60 = vmul.f32 %v1210_v14, %v1210_v14  ;;  %v1035_v30 = vpop.f32.mrf.mxu1 }
 0x146   :  { %v695_v18 = vadd.f32 %v1200_v41, %v694_v12  ;;  %v830_v20 = vadd.f32 %v829_v15, %v767_v13  ;;  %v771_v41 = vmul.f32 %v1214_v32, %v1214_v32  ;;  %v614_v36 = vpop.f32.mrf.mxu1  ;;  %v784_v12 = vmul.f32 %v1230_v62, %v1230_v62 }
 0x147   :  { %v785_v15 = vmul.f32 %v1032_v16, %v1032_v16 }
 0x148   :  { %v831_v22 = vadd.f32 %v830_v20, %v768_v17  ;;  %v696_v24 = vadd.f32 %v1204_v50, %v695_v18  ;;  %v1036_v45 = vpop.f32.mrf.mxu1 }
 0x14a   :  { %v697_v25 = vadd.f32 %v696_v24, %v1210_v14  ;;  %v832_v26 = vadd.f32 %v831_v22, %v769_v21  ;;  %v617_v51 = vpop.f32.mrf.mxu1 }
 0x14c   :  { %v833_v27 = vadd.f32 %v832_v26, %v770_v60  ;;  %v698_v28 = vadd.f32 %v697_v25, %v1214_v32  ;;  %v1039_v59 = vpop.f32.mrf.mxu1  ;;  %v787_v25 = vmul.f32 %v617_v51, %v617_v51  ;;  %v788_v26 = vmul.f32 %v1035_v30, %v1035_v30 }
 0x14e   :  { %v699_v33 = vadd.f32 %v1208_v5, %v698_v28  ;;  %v834_v50 = vadd.f32 %v833_v27, %v771_v41  ;;  %v775_v5 = vmul.f32 %v1222_v9, %v1222_v9  ;;  %v630_v3 = vpop.f32.mrf.mxu1  ;;  %v789_v28 = vmul.f32 %v1036_v45, %v1036_v45 }
 0x150   :  { %v835_v35 = vadd.f32 %v834_v50, %v772_v31  ;;  %v700_v14 = vadd.f32 %v1212_v23, %v699_v33  ;;  %v1040_v11 = vpop.f32.mrf.mxu1  ;;  %v790_v50 = vmul.f32 %v630_v3, %v630_v3 }
 0x152   :  { %v701_v37 = vadd.f32 %v700_v14, %v1218_v53  ;;  %v836_v32 = vadd.f32 %v835_v35, %v773_v34  ;;  %v633_v20 = vpop.f32.mrf.mxu1 }
 0x153   :  { %v791_v14 = vmul.f32 %v633_v20, %v633_v20 }
 0x154   :  { %v837_v40 = vadd.f32 %v836_v32, %v774_v38  ;;  %v702_v43 = vadd.f32 %v701_v37, %v1222_v9  ;;  %v1043_v60 = vpop.f32.mrf.mxu1 }
 0x156   :  { %v703_v47 = vadd.f32 %v1216_v42, %v702_v43  ;;  %v838_v23 = vadd.f32 %v837_v40, %v775_v5  ;;  %v780_v42 = vmul.f32 %v1224_v19, %v1224_v19  ;;  %v646_v33 = vpop.f32.mrf.mxu1  ;;  %v793_v40 = vmul.f32 %v1040_v11, %v1040_v11 }
 0x158   :  { %v839_v49 = vadd.f32 %v838_v23, %v776_v46  ;;  %v704_v53 = vadd.f32 %v1220_v63, %v703_v47  ;;  %v781_v63 = vmul.f32 %v1228_v39, %v1228_v39  ;;  %v1044_v37 = vpop.f32.mrf.mxu1  ;;  %v794_v47 = vmul.f32 %v646_v33, %v646_v33 }
 0x15a   :  { %v705_v54 = vadd.f32 %v704_v53, %v1226_v29  ;;  %v840_v9 = vadd.f32 %v839_v49, %v777_v48  ;;  %v782_v29 = vmul.f32 %v598_v7, %v598_v7  ;;  %v649_v46 = vpop.f32.mrf.mxu1  ;;  %v796_v53 = vmul.f32 %v1043_v60, %v1043_v60 }
 0x15b   :  { %v795_v49 = vmul.f32 %v649_v46, %v649_v46 }
 0x15c   :  { %v841_v56 = vadd.f32 %v840_v9, %v778_v55  ;;  %v706_v57 = vadd.f32 %v705_v54, %v585_v52  ;;  %v783_v52 = vmul.f32 %v601_v44, %v601_v44  ;;  %v797_v55 = vmul.f32 %v1044_v37, %v1044_v37 }
 0x15e   :  { %v707_v61 = vadd.f32 %v1224_v19, %v706_v57  ;;  %v842_v0 = vadd.f32 %v841_v56, %v779_v58 }
 0x160   :  { %v843_v1 = vadd.f32 %v842_v0, %v780_v42  ;;  %v708_v2 = vadd.f32 %v1228_v39, %v707_v61  ;;  %v786_v39 = vmul.f32 %v614_v36, %v614_v36 }
 0x162   :  { %v709_v4 = vadd.f32 %v708_v2, %v598_v7  ;;  %v844_v6 = vadd.f32 %v843_v1, %v781_v63 }
 0x164   :  { %v845_v8 = vadd.f32 %v844_v6, %v782_v29  ;;  %v710_v10 = vadd.f32 %v709_v4, %v601_v44  ;;  %v661_v4 = vld [vmem:[#allocation7] sm:$0x1] }
 0x166   :  { %v711_v19 = vadd.f32 %v1230_v62, %v710_v10  ;;  %v846_v13 = vadd.f32 %v845_v8, %v783_v52  ;;  %v733_v8 = vld [vmem:[#allocation7 + $0x1] sm:$0x1] }
 0x168   :  { %v847_v17 = vadd.f32 %v846_v13, %v784_v12  ;;  %v712_v18 = vadd.f32 %v1032_v16, %v711_v19 }
 0x16a   :  { %v713_v21 = vadd.f32 %v712_v18, %v614_v36  ;;  %v848_v22 = vadd.f32 %v847_v17, %v785_v15  ;;  %v792_v36 = vmul.f32 %v1039_v59, %v1039_v59 }
 0x16c   :  { %v849_v24 = vadd.f32 %v848_v22, %v786_v39  ;;  %v714_v7 = vadd.f32 %v713_v21, %v617_v51 }
 0x16e   :  { %v715_v44 = vadd.f32 %v1035_v30, %v714_v7  ;;  %v850_v27 = vadd.f32 %v849_v24, %v787_v25 }
 0x170   :  { %v851_v41 = vadd.f32 %v850_v27, %v788_v26  ;;  %v716_v31 = vadd.f32 %v1036_v45, %v715_v44 }
 0x172   :  { %v717_v62 = vadd.f32 %v716_v31, %v630_v3  ;;  %v852_v34 = vadd.f32 %v851_v41, %v789_v28 }
 0x174   :  { %v853_v35 = vadd.f32 %v852_v34, %v790_v50  ;;  %v718_v16 = vadd.f32 %v717_v62, %v633_v20 }
 0x176   :  { %v719_v38 = vadd.f32 %v1039_v59, %v718_v16  ;;  %v854_v32 = vadd.f32 %v853_v35, %v791_v14 }
 0x178   :  { %v855_v43 = vadd.f32 %v854_v32, %v792_v36  ;;  %v720_v5 = vadd.f32 %v1040_v11, %v719_v38 }
 0x17a   :  { %v721_v30 = vadd.f32 %v720_v5, %v646_v33  ;;  %v856_v23 = vadd.f32 %v855_v43, %v793_v40 }
 0x17c   :  { %v857_v48 = vadd.f32 %v856_v23, %v794_v47  ;;  %v722_v45 = vadd.f32 %v721_v30, %v649_v46 }
 0x17e   :  { %v723_v51 = vadd.f32 %v1043_v60, %v722_v45  ;;  %v858_v54 = vadd.f32 %v857_v48, %v795_v49 }
 0x180   :  { %v724_v9 = vadd.f32 %v1044_v37, %v723_v51  ;;  %v859_v56 = vadd.f32 %v858_v54, %v796_v53 }
 0x182   :  { %v725_v57 = vrot.slane %v724_v9, 4  ;;  %v860_v58 = vadd.f32 %v859_v56, %v797_v55 }
 0x184   :  { %v726_v59 = vadd.f32 %v725_v57, %v724_v9  ;;  %v861_v42 = vrot.slane %v860_v58, 4 }
 0x186   :  { %v727_v61 = vrot.slane %v726_v59, 2  ;;  %v862_v0 = vadd.f32 %v861_v42, %v860_v58 }
 0x188   :  { %v728_v63 = vadd.f32 %v727_v61, %v726_v59  ;;  %v863_v1 = vrot.slane %v862_v0, 2 }
 0x18a   :  { %v729_v2 = vrot.slane %v728_v63, 1  ;;  %v864_v3 = vadd.f32 %v863_v1, %v862_v0 }
 0x18c   :  { %v730_v29 = vadd.f32 %v729_v2, %v728_v63  ;;  %v865_v6 = vrot.slane %v864_v3, 1 }
 0x18e   :  { %v866_v10 = vadd.f32 %v865_v6, %v864_v3  ;;  %v731_v52 = vadd.f32 %v730_v29, %v661_v4 }
 0x190   :  { %732 = vst [vmem:[#allocation7] sm:$0x1] %v731_v52  ;;  %v867_v11 = vadd.f32 %v866_v10, %v733_v8 }
 0x192   :  { %868 = vst [vmem:[#allocation7 + $0x1] sm:$0x1] %v867_v11 }
 0x193   :  { %1158 = shalt.err (!%p1155_p0)
}
 0x194   :  { %878 = dma.vmem_to_hbm [thread:$0]  %s876_s1, 128, %s1285_s2, [#allocation4]  }
 0x195   :  { %1171 = dma.done.wait [#allocation4], 128  }
 0x196   :  { %1172 = vsyncadd [#allocation4], 4294967168 }
 0x197   :  { %882 = vsyncpa [#allocation3], 1 }
 0x198   :  { %883 = vsyncpa [#allocation6], 1 }
 0x199   :  { %884 = vsyncpa [#allocation4], 1 }

</bundles_post_ra>
